<compile_context>
chip_gen: v7x
topology: tpu7x:2x2x1
jax: 0.10.0
libtpu: 0.0.40
codegen_flags: <defaults>
</compile_context>

<pallas_src>
import functools

import jax
import jax.numpy as jnp
import numpy as np
from jax.experimental import pallas as pl
from jax.experimental.pallas import tpu as pltpu


def _round_up(x, m):
    return (x + m - 1) // m * m


def _encoder_kernel(x_ref, w1_ref, b1_ref, w2_ref, b2_ref, o_ref,
                    *, C, K1, T1, compute_dtype):
    """Fused WindowLayer + 2-layer conv encoder for one (batch, window-tile).

    x_ref : (C, TNW, W0)  input dtype   TNW windows in X's natural layout
    w1_ref: (C, H, K1)    compute dtype true conv1 weight, per channel
    b1_ref: (H, 1)        f32
    w2_ref: (T1, L, H)    compute dtype conv2 weight, taps on the leading axis
    b2_ref: (L, 1)        f32
    o_ref : (L, TNW)      output dtype  one latent column per lane (lane-dense)
    """
    # Windows -> lanes: one cheap 2-D (XLU) transpose per channel.  Everything
    # downstream is lane-dense, so both MXU dots and the store are unmasked.
    pc = [x_ref[c].T.astype(compute_dtype) for c in range(C)]      # each (W0, TNW)

    z = None
    for t in range(T1):                           # static tap loop (T1 is small)
        # conv1, tap t: contract over (c, k) with the true (H, K1) weights.
        h = None
        for c in range(C):
            d = jnp.dot(w1_ref[c], pc[c][t * K1:(t + 1) * K1, :],
                        preferred_element_type=jnp.float32)        # (H, TNW)
            h = d if h is None else h + d
        h = jnp.maximum(h + b1_ref[...], 0.0)                      # bias + ReLU, f32
        # conv2, tap t: contract over hidden, accumulate over taps in f32.
        zt = jnp.dot(w2_ref[t], h.astype(compute_dtype),
                     preferred_element_type=jnp.float32)           # (L, TNW)
        z = zt if z is None else z + zt

    o_ref[...] = (z + b2_ref[...]).astype(o_ref.dtype)


def strided_encoder_forward(X, params, window_size, compute_dtype=jnp.bfloat16):
    """Pallas implementation of StridedEncoder.forward.  X: (B, C, T).

    Pass compute_dtype=jnp.float32 for bit-closer parity with the f32 reference.
    """
    W1, b1, W2, b2 = params["W1"], params["b1"], params["W2"], params["b2"]
    B, C, T = X.shape
    H, C_, K1 = W1.shape
    L, H_, K2 = W2.shape
    assert C_ == C and H_ == H
    W0 = window_size
    n_windows = T // W0
    assert n_windows >= 1, "input shorter than one window"
    T1 = (W0 - K1) // K1 + 1                  # conv1 output length (stride == K1)
    assert K2 == T1, "conv2 must reduce conv1's output length to 1 (.squeeze(-1))"
    out_dtype = X.dtype

    # WindowLayer narrow + window split.  Pure metadata reshape when T is a
    # multiple of window_size; otherwise one slice copy (the unavoidable narrow()).
    # The windows->lanes relayout itself happens inside the kernel.
    Xw = X[..., : n_windows * W0].reshape(B, C, n_windows, W0)

    # Kernel-friendly weight layouts (tiny; true weights only, no block-diagonal).
    W1k = jnp.transpose(W1, (1, 0, 2)).astype(compute_dtype)       # (C, H, K1)
    W2k = jnp.transpose(W2, (2, 0, 1)).astype(compute_dtype)       # (T1, L, H)
    b1k = b1.reshape(H, 1).astype(jnp.float32)
    b2k = b2.reshape(L, 1).astype(jnp.float32)

    # ---- lane-tile (TNW windows per grid step): generation-aware VMEM budget ----
    try:
        vmem_cap = int(pltpu.get_tpu_info().vmem_capacity_bytes)   # 128 MiB v5e/v6e, 64 MiB v7x
    except Exception:  # pragma: no cover - conservative fallback
        vmem_cap = 64 * 1024 * 1024
    in_item = jnp.dtype(X.dtype).itemsize
    cd_item = jnp.dtype(compute_dtype).itemsize
    out_item = jnp.dtype(out_dtype).itemsize
    # Per-window VMEM bytes: double-buffered input block (its minor dim W0 is
    # lane-padded to 128 in VMEM), transposed per-channel copies, conv
    # activations (f32 accumulation) and the double-buffered output block.
    per_window = (2 * C * _round_up(W0, 128) * in_item
                  + C * _round_up(W0, 8) * (in_item + cd_item)
                  + C * K1 * cd_item
                  + 3 * H * 4
                  + 2 * L * 4
                  + 2 * L * out_item)
    budget = max(2 << 20, vmem_cap // 3)
    tnw_cap = max(128, budget // per_window // 128 * 128)

    if n_windows <= 128:
        TNW = n_windows                        # single full-extent tile per batch
    else:
        # Lane-dense multiple of 128; >= 2 window tiles when there is enough work
        # (keeps both v7x TensorCores busy even at B == 1); 32K hard cap.
        TNW = min(tnw_cap, _round_up(pl.cdiv(n_windows, 2), 128), 32768)
    num_w_tiles = pl.cdiv(n_windows, TNW)      # ragged last tile handled by Pallas

    kernel = functools.partial(_encoder_kernel, C=C, K1=K1, T1=T1,
                               compute_dtype=compute_dtype)
    one_buf = pl.Buffered(1)                   # invariant weight/bias operands

    # NOTE: when W0 < 128 the input-block DMA has small inner runs; those
    # configs are tiny anyway.  TODO(synk): benchmark pl.Buffered(3) on the
    # patch spec for very long sequences (pipeline is pure DMA).
    out = pl.pallas_call(
        kernel,
        out_shape=jax.ShapeDtypeStruct((B, L, n_windows), out_dtype),
        grid_spec=pl.GridSpec(
            grid=(B, num_w_tiles),
            in_specs=[
                pl.BlockSpec((pl.Squeezed(), C, TNW, W0),
                             lambda b, i: (b, 0, i, 0)),
                pl.BlockSpec((C, H, K1), lambda b, i: (0, 0, 0),
                             pipeline_mode=one_buf),
                pl.BlockSpec((H, 1), lambda b, i: (0, 0),
                             pipeline_mode=one_buf),
                pl.BlockSpec((T1, L, H), lambda b, i: (0, 0, 0),
                             pipeline_mode=one_buf),
                pl.BlockSpec((L, 1), lambda b, i: (0, 0),
                             pipeline_mode=one_buf),
            ],
            out_specs=pl.BlockSpec((pl.Squeezed(), L, TNW),
                                   lambda b, i: (b, 0, i)),
        ),
        compiler_params=pltpu.CompilerParams(
            dimension_semantics=("parallel", "parallel"),
            vmem_limit_bytes=int(min(vmem_cap, max(32 << 20, vmem_cap * 3 // 4))),
        ),
    )(Xw, W1k, b1k, W2k, b2k)
    return out                                  # already (B, L, n_windows), X.dtype


def reference_forward(X, params, window_size):
    """Pure-JAX f32 reference (lax conv) matching PyTorch semantics exactly."""
    W1, b1, W2, b2 = params["W1"], params["b1"], params["W2"], params["b2"]
    B, C, T = X.shape
    H, _, K1 = W1.shape
    L, _, K2 = W2.shape
    n_windows = T // window_size
    X1 = X[..., : n_windows * window_size]
    X2 = jnp.moveaxis(X1.reshape(B, C, n_windows, window_size), -2, 0)
    X3 = X2.reshape(n_windows * B, C, window_size)
    y = jax.lax.conv_general_dilated(
        X3, W1, (K1,), "VALID", dimension_numbers=("NCH", "OIH", "NCH"))
    y = jnp.maximum(y + b1[None, :, None], 0.0)
    z = jax.lax.conv_general_dilated(
        y, W2, (1,), "VALID", dimension_numbers=("NCH", "OIH", "NCH"))
    z = z + b2[None, :, None]                                      # (N, L, 1)
    lat = z.reshape(n_windows, B, L, 1)[..., 0]
    return jnp.moveaxis(lat, 0, -1)


if __name__ == "__main__":
    key = jax.random.PRNGKey(0)
    B, C, T = 2, 4, 67          # T not a multiple of window_size: exercises narrow()
    window_size = 8
    H, L, K1 = 32, 16, 4
    K2 = window_size // K1      # = 2, conv2 consumes conv1's full output length

    k0, k1, k2, k3, k4 = jax.random.split(key, 5)
    X = jax.random.normal(k0, (B, C, T), jnp.float32)
    params = dict(
        W1=0.1 * jax.random.normal(k1, (H, C, K1), jnp.float32),
        b1=0.1 * jax.random.normal(k2, (H,), jnp.float32),
        W2=0.1 * jax.random.normal(k3, (L, H, K2), jnp.float32),
        b2=0.1 * jax.random.normal(k4, (L,), jnp.float32),
    )

    fwd = jax.jit(functools.partial(strided_encoder_forward, window_size=window_size))
    out = jax.block_until_ready(fwd(X, params))

    ref = reference_forward(X, params, window_size)
    assert out.shape == (B, L, T // window_size), out.shape
    # bf16 MXU dots with f32 accumulation -> compare against the f32 reference
    # at a bf16-appropriate tolerance.
    np.testing.assert_allclose(np.asarray(out), np.asarray(ref),
                               rtol=3e-2, atol=3e-2)
    print("KERNEL_OK")
</pallas_src>

<mosaic_0001>
module attributes {stable_mosaic.version = 11 : i64} {
  func.func @_encoder_kernel(%arg0: i32, %arg1: i32, %arg2: memref<1x4x8x8xf32, #tpu.memory_space<vmem>>, %arg3: memref<4x32x4xbf16, #tpu.memory_space<vmem>>, %arg4: memref<32x1xf32, #tpu.memory_space<vmem>>, %arg5: memref<2x16x32xbf16, #tpu.memory_space<vmem>>, %arg6: memref<16x1xf32, #tpu.memory_space<vmem>>, %arg7: memref<1x16x8xf32, #tpu.memory_space<vmem>>) attributes {dimension_semantics = [#tpu.dimension_semantics<parallel>, #tpu.dimension_semantics<parallel>], iteration_bounds = array<i64: 2, 1>, scalar_prefetch = 0 : i64, scratch_operands = 0 : i64, tpu.core_type = #tpu.core_type<tc>, window_params = [{transform_indices = @transform_0, window_bounds = array<i64: 1, 4, 8, 8>}, {pipeline_mode = #tpu.pipeline_mode<synchronous>, transform_indices = @transform_1, window_bounds = array<i64: 4, 32, 4>}, {pipeline_mode = #tpu.pipeline_mode<synchronous>, transform_indices = @transform_2, window_bounds = array<i64: 32, 1>}, {pipeline_mode = #tpu.pipeline_mode<synchronous>, transform_indices = @transform_3, window_bounds = array<i64: 2, 16, 32>}, {pipeline_mode = #tpu.pipeline_mode<synchronous>, transform_indices = @transform_4, window_bounds = array<i64: 16, 1>}, {transform_indices = @transform_5, window_bounds = array<i64: 1, 16, 8>}]} {
    %c0 = arith.constant 0 : index
    %c0_0 = arith.constant 0 : index
    %c0_1 = arith.constant 0 : index
    %c0_2 = arith.constant 0 : index
    %0 = vector.load %arg2[%c0, %c0_0, %c0_1, %c0_2] : memref<1x4x8x8xf32, #tpu.memory_space<vmem>>, vector<1x1x8x8xf32>
    %1 = vector.shape_cast %0 : vector<1x1x8x8xf32> to vector<8x8xf32>
    %2 = tpu.transpose %1, [1, 0] : vector<8x8xf32> -> vector<8x8xf32>
    %3 = arith.truncf %2 : vector<8x8xf32> to vector<8x8xbf16>
    %c0_3 = arith.constant 0 : index
    %c1 = arith.constant 1 : index
    %c0_4 = arith.constant 0 : index
    %c0_5 = arith.constant 0 : index
    %4 = vector.load %arg2[%c0_3, %c1, %c0_4, %c0_5] : memref<1x4x8x8xf32, #tpu.memory_space<vmem>>, vector<1x1x8x8xf32>
    %5 = vector.shape_cast %4 : vector<1x1x8x8xf32> to vector<8x8xf32>
    %6 = tpu.transpose %5, [1, 0] : vector<8x8xf32> -> vector<8x8xf32>
    %7 = arith.truncf %6 : vector<8x8xf32> to vector<8x8xbf16>
    %c0_6 = arith.constant 0 : index
    %c2 = arith.constant 2 : index
    %c0_7 = arith.constant 0 : index
    %c0_8 = arith.constant 0 : index
    %8 = vector.load %arg2[%c0_6, %c2, %c0_7, %c0_8] : memref<1x4x8x8xf32, #tpu.memory_space<vmem>>, vector<1x1x8x8xf32>
    %9 = vector.shape_cast %8 : vector<1x1x8x8xf32> to vector<8x8xf32>
    %10 = tpu.transpose %9, [1, 0] : vector<8x8xf32> -> vector<8x8xf32>
    %11 = arith.truncf %10 : vector<8x8xf32> to vector<8x8xbf16>
    %c0_9 = arith.constant 0 : index
    %c3 = arith.constant 3 : index
    %c0_10 = arith.constant 0 : index
    %c0_11 = arith.constant 0 : index
    %12 = vector.load %arg2[%c0_9, %c3, %c0_10, %c0_11] : memref<1x4x8x8xf32, #tpu.memory_space<vmem>>, vector<1x1x8x8xf32>
    %13 = vector.shape_cast %12 : vector<1x1x8x8xf32> to vector<8x8xf32>
    %14 = tpu.transpose %13, [1, 0] : vector<8x8xf32> -> vector<8x8xf32>
    %15 = arith.truncf %14 : vector<8x8xf32> to vector<8x8xbf16>
    %c0_12 = arith.constant 0 : index
    %c0_13 = arith.constant 0 : index
    %c0_14 = arith.constant 0 : index
    %16 = vector.load %arg3[%c0_12, %c0_13, %c0_14] : memref<4x32x4xbf16, #tpu.memory_space<vmem>>, vector<1x32x4xbf16>
    %17 = vector.shape_cast %16 : vector<1x32x4xbf16> to vector<32x4xbf16>
    %18 = vector.extract_strided_slice %3 {offsets = [0, 0], sizes = [4, 8], strides = [1, 1]} : vector<8x8xbf16> to vector<4x8xbf16>
    %cst = arith.constant dense<0.000000e+00> : vector<32x8xf32>
    %19 = tpu.matmul %17, %18, %cst {dimension_numbers = #tpu.dot_dimension_numbers<[1], [0], [0], [1], [0, 0, 1, 1], [], []>} : vector<32x4xbf16>, vector<4x8xbf16>, vector<32x8xf32> -> vector<32x8xf32>
    %c1_15 = arith.constant 1 : index
    %c0_16 = arith.constant 0 : index
    %c0_17 = arith.constant 0 : index
    %20 = vector.load %arg3[%c1_15, %c0_16, %c0_17] : memref<4x32x4xbf16, #tpu.memory_space<vmem>>, vector<1x32x4xbf16>
    %21 = vector.shape_cast %20 : vector<1x32x4xbf16> to vector<32x4xbf16>
    %22 = vector.extract_strided_slice %7 {offsets = [0, 0], sizes = [4, 8], strides = [1, 1]} : vector<8x8xbf16> to vector<4x8xbf16>
    %cst_18 = arith.constant dense<0.000000e+00> : vector<32x8xf32>
    %23 = tpu.matmul %21, %22, %cst_18 {dimension_numbers = #tpu.dot_dimension_numbers<[1], [0], [0], [1], [0, 0, 1, 1], [], []>} : vector<32x4xbf16>, vector<4x8xbf16>, vector<32x8xf32> -> vector<32x8xf32>
    %24 = arith.addf %19, %23 : vector<32x8xf32>
    %c2_19 = arith.constant 2 : index
    %c0_20 = arith.constant 0 : index
    %c0_21 = arith.constant 0 : index
    %25 = vector.load %arg3[%c2_19, %c0_20, %c0_21] : memref<4x32x4xbf16, #tpu.memory_space<vmem>>, vector<1x32x4xbf16>
    %26 = vector.shape_cast %25 : vector<1x32x4xbf16> to vector<32x4xbf16>
    %27 = vector.extract_strided_slice %11 {offsets = [0, 0], sizes = [4, 8], strides = [1, 1]} : vector<8x8xbf16> to vector<4x8xbf16>
    %cst_22 = arith.constant dense<0.000000e+00> : vector<32x8xf32>
    %28 = tpu.matmul %26, %27, %cst_22 {dimension_numbers = #tpu.dot_dimension_numbers<[1], [0], [0], [1], [0, 0, 1, 1], [], []>} : vector<32x4xbf16>, vector<4x8xbf16>, vector<32x8xf32> -> vector<32x8xf32>
    %29 = arith.addf %24, %28 : vector<32x8xf32>
    %c3_23 = arith.constant 3 : index
    %c0_24 = arith.constant 0 : index
    %c0_25 = arith.constant 0 : index
    %30 = vector.load %arg3[%c3_23, %c0_24, %c0_25] : memref<4x32x4xbf16, #tpu.memory_space<vmem>>, vector<1x32x4xbf16>
    %31 = vector.shape_cast %30 : vector<1x32x4xbf16> to vector<32x4xbf16>
    %32 = vector.extract_strided_slice %15 {offsets = [0, 0], sizes = [4, 8], strides = [1, 1]} : vector<8x8xbf16> to vector<4x8xbf16>
    %cst_26 = arith.constant dense<0.000000e+00> : vector<32x8xf32>
    %33 = tpu.matmul %31, %32, %cst_26 {dimension_numbers = #tpu.dot_dimension_numbers<[1], [0], [0], [1], [0, 0, 1, 1], [], []>} : vector<32x4xbf16>, vector<4x8xbf16>, vector<32x8xf32> -> vector<32x8xf32>
    %34 = arith.addf %29, %33 : vector<32x8xf32>
    %c0_27 = arith.constant 0 : index
    %c0_28 = arith.constant 0 : index
    %35 = vector.load %arg4[%c0_27, %c0_28] : memref<32x1xf32, #tpu.memory_space<vmem>>, vector<32x1xf32>
    %36 = vector.broadcast %35 : vector<32x1xf32> to vector<32x8xf32>
    %37 = arith.addf %34, %36 : vector<32x8xf32>
    %cst_29 = arith.constant 0.000000e+00 : f32
    %38 = vector.broadcast %cst_29 : f32 to vector<32x8xf32>
    %39 = arith.maximumf %37, %38 : vector<32x8xf32>
    %c0_30 = arith.constant 0 : index
    %c0_31 = arith.constant 0 : index
    %c0_32 = arith.constant 0 : index
    %40 = vector.load %arg5[%c0_30, %c0_31, %c0_32] : memref<2x16x32xbf16, #tpu.memory_space<vmem>>, vector<1x16x32xbf16>
    %41 = vector.shape_cast %40 : vector<1x16x32xbf16> to vector<16x32xbf16>
    %42 = arith.truncf %39 : vector<32x8xf32> to vector<32x8xbf16>
    %cst_33 = arith.constant dense<0.000000e+00> : vector<16x8xf32>
    %43 = tpu.matmul %41, %42, %cst_33 {dimension_numbers = #tpu.dot_dimension_numbers<[1], [0], [0], [1], [0, 0, 1, 1], [], []>} : vector<16x32xbf16>, vector<32x8xbf16>, vector<16x8xf32> -> vector<16x8xf32>
    %c0_34 = arith.constant 0 : index
    %c0_35 = arith.constant 0 : index
    %c0_36 = arith.constant 0 : index
    %44 = vector.load %arg3[%c0_34, %c0_35, %c0_36] : memref<4x32x4xbf16, #tpu.memory_space<vmem>>, vector<1x32x4xbf16>
    %45 = vector.shape_cast %44 : vector<1x32x4xbf16> to vector<32x4xbf16>
    %46 = vector.extract_strided_slice %3 {offsets = [4, 0], sizes = [4, 8], strides = [1, 1]} : vector<8x8xbf16> to vector<4x8xbf16>
    %cst_37 = arith.constant dense<0.000000e+00> : vector<32x8xf32>
    %47 = tpu.matmul %45, %46, %cst_37 {dimension_numbers = #tpu.dot_dimension_numbers<[1], [0], [0], [1], [0, 0, 1, 1], [], []>} : vector<32x4xbf16>, vector<4x8xbf16>, vector<32x8xf32> -> vector<32x8xf32>
    %c1_38 = arith.constant 1 : index
    %c0_39 = arith.constant 0 : index
    %c0_40 = arith.constant 0 : index
    %48 = vector.load %arg3[%c1_38, %c0_39, %c0_40] : memref<4x32x4xbf16, #tpu.memory_space<vmem>>, vector<1x32x4xbf16>
    %49 = vector.shape_cast %48 : vector<1x32x4xbf16> to vector<32x4xbf16>
    %50 = vector.extract_strided_slice %7 {offsets = [4, 0], sizes = [4, 8], strides = [1, 1]} : vector<8x8xbf16> to vector<4x8xbf16>
    %cst_41 = arith.constant dense<0.000000e+00> : vector<32x8xf32>
    %51 = tpu.matmul %49, %50, %cst_41 {dimension_numbers = #tpu.dot_dimension_numbers<[1], [0], [0], [1], [0, 0, 1, 1], [], []>} : vector<32x4xbf16>, vector<4x8xbf16>, vector<32x8xf32> -> vector<32x8xf32>
    %52 = arith.addf %47, %51 : vector<32x8xf32>
    %c2_42 = arith.constant 2 : index
    %c0_43 = arith.constant 0 : index
    %c0_44 = arith.constant 0 : index
    %53 = vector.load %arg3[%c2_42, %c0_43, %c0_44] : memref<4x32x4xbf16, #tpu.memory_space<vmem>>, vector<1x32x4xbf16>
    %54 = vector.shape_cast %53 : vector<1x32x4xbf16> to vector<32x4xbf16>
    %55 = vector.extract_strided_slice %11 {offsets = [4, 0], sizes = [4, 8], strides = [1, 1]} : vector<8x8xbf16> to vector<4x8xbf16>
    %cst_45 = arith.constant dense<0.000000e+00> : vector<32x8xf32>
    %56 = tpu.matmul %54, %55, %cst_45 {dimension_numbers = #tpu.dot_dimension_numbers<[1], [0], [0], [1], [0, 0, 1, 1], [], []>} : vector<32x4xbf16>, vector<4x8xbf16>, vector<32x8xf32> -> vector<32x8xf32>
    %57 = arith.addf %52, %56 : vector<32x8xf32>
    %c3_46 = arith.constant 3 : index
    %c0_47 = arith.constant 0 : index
    %c0_48 = arith.constant 0 : index
    %58 = vector.load %arg3[%c3_46, %c0_47, %c0_48] : memref<4x32x4xbf16, #tpu.memory_space<vmem>>, vector<1x32x4xbf16>
    %59 = vector.shape_cast %58 : vector<1x32x4xbf16> to vector<32x4xbf16>
    %60 = vector.extract_strided_slice %15 {offsets = [4, 0], sizes = [4, 8], strides = [1, 1]} : vector<8x8xbf16> to vector<4x8xbf16>
    %cst_49 = arith.constant dense<0.000000e+00> : vector<32x8xf32>
    %61 = tpu.matmul %59, %60, %cst_49 {dimension_numbers = #tpu.dot_dimension_numbers<[1], [0], [0], [1], [0, 0, 1, 1], [], []>} : vector<32x4xbf16>, vector<4x8xbf16>, vector<32x8xf32> -> vector<32x8xf32>
    %62 = arith.addf %57, %61 : vector<32x8xf32>
    %c0_50 = arith.constant 0 : index
    %c0_51 = arith.constant 0 : index
    %63 = vector.load %arg4[%c0_50, %c0_51] : memref<32x1xf32, #tpu.memory_space<vmem>>, vector<32x1xf32>
    %64 = vector.broadcast %63 : vector<32x1xf32> to vector<32x8xf32>
    %65 = arith.addf %62, %64 : vector<32x8xf32>
    %cst_52 = arith.constant 0.000000e+00 : f32
    %66 = vector.broadcast %cst_52 : f32 to vector<32x8xf32>
    %67 = arith.maximumf %65, %66 : vector<32x8xf32>
    %c1_53 = arith.constant 1 : index
    %c0_54 = arith.constant 0 : index
    %c0_55 = arith.constant 0 : index
    %68 = vector.load %arg5[%c1_53, %c0_54, %c0_55] : memref<2x16x32xbf16, #tpu.memory_space<vmem>>, vector<1x16x32xbf16>
    %69 = vector.shape_cast %68 : vector<1x16x32xbf16> to vector<16x32xbf16>
    %70 = arith.truncf %67 : vector<32x8xf32> to vector<32x8xbf16>
    %cst_56 = arith.constant dense<0.000000e+00> : vector<16x8xf32>
    %71 = tpu.matmul %69, %70, %cst_56 {dimension_numbers = #tpu.dot_dimension_numbers<[1], [0], [0], [1], [0, 0, 1, 1], [], []>} : vector<16x32xbf16>, vector<32x8xbf16>, vector<16x8xf32> -> vector<16x8xf32>
    %72 = arith.addf %43, %71 : vector<16x8xf32>
    %c0_57 = arith.constant 0 : index
    %c0_58 = arith.constant 0 : index
    %73 = vector.load %arg6[%c0_57, %c0_58] : memref<16x1xf32, #tpu.memory_space<vmem>>, vector<16x1xf32>
    %74 = vector.broadcast %73 : vector<16x1xf32> to vector<16x8xf32>
    %75 = arith.addf %72, %74 : vector<16x8xf32>
    %c0_59 = arith.constant 0 : index
    %c0_60 = arith.constant 0 : index
    %c0_61 = arith.constant 0 : index
    %76 = vector.load %arg7[%c0_59, %c0_60, %c0_61] : memref<1x16x8xf32, #tpu.memory_space<vmem>>, vector<1x16x8xf32>
    %77 = vector.shape_cast %76 : vector<1x16x8xf32> to vector<16x8xf32>
    %78 = vector.shape_cast %75 : vector<16x8xf32> to vector<1x16x8xf32>
    tpu.vector_store %arg7[%c0_59, %c0_60, %c0_61], %78 {strides = array<i32>} : memref<1x16x8xf32, #tpu.memory_space<vmem>>, vector<1x16x8xf32>,
    return
  }
  func.func @transform_0(%arg0: i32, %arg1: i32) -> (i32, i32, i32, i32) {
    %c0_i32 = arith.constant 0 : i32
    %c0_i32_0 = arith.constant 0 : i32
    %c0_i32_1 = arith.constant 0 : i32
    return %arg0, %c0_i32, %arg1, %c0_i32_0 : i32, i32, i32, i32
  }
  func.func @transform_1(%arg0: i32, %arg1: i32) -> (i32, i32, i32) {
    %c0_i32 = arith.constant 0 : i32
    %c0_i32_0 = arith.constant 0 : i32
    %c0_i32_1 = arith.constant 0 : i32
    %c0_i32_2 = arith.constant 0 : i32
    return %c0_i32, %c0_i32_0, %c0_i32_1 : i32, i32, i32
  }
  func.func @transform_2(%arg0: i32, %arg1: i32) -> (i32, i32) {
    %c0_i32 = arith.constant 0 : i32
    %c0_i32_0 = arith.constant 0 : i32
    %c0_i32_1 = arith.constant 0 : i32
    return %c0_i32, %c0_i32_0 : i32, i32
  }
  func.func @transform_3(%arg0: i32, %arg1: i32) -> (i32, i32, i32) {
    %c0_i32 = arith.constant 0 : i32
    %c0_i32_0 = arith.constant 0 : i32
    %c0_i32_1 = arith.constant 0 : i32
    %c0_i32_2 = arith.constant 0 : i32
    return %c0_i32, %c0_i32_0, %c0_i32_1 : i32, i32, i32
  }
  func.func @transform_4(%arg0: i32, %arg1: i32) -> (i32, i32) {
    %c0_i32 = arith.constant 0 : i32
    %c0_i32_0 = arith.constant 0 : i32
    %c0_i32_1 = arith.constant 0 : i32
    return %c0_i32, %c0_i32_0 : i32, i32
  }
  func.func @transform_5(%arg0: i32, %arg1: i32) -> (i32, i32, i32) {
    %c0_i32 = arith.constant 0 : i32
    %c0_i32_0 = arith.constant 0 : i32
    return %arg0, %c0_i32, %arg1 : i32, i32, i32
  }
}

</mosaic_0001>

<bundles_post_ra>
// kernel: strided_encoder_forward.1
= control target key start
LH: loop header
LB: loop body
LE: loop exit
PB: predicated region body
PF: predicated region fallthrough
CT: control target
= control target key end

     0   :  { %s1449_s18 = smov 0   ;;  %s1451_s19 = smov 0   ;;  %s1566_s0 = inlined_call_operand.vmem [shape: f32[2,4,8,8], index: 0, kind: input, shape index: {}]   ;;  %s1567_s1 = inlined_call_operand.vmem [shape: bf16[4,32,4], index: 1, kind: input, shape index: {}]   ;;  %s1568_s2 = inlined_call_operand.vmem [shape: f32[32,1], index: 2, kind: input, shape index: {}]   ;;  %s1569_s3 = inlined_call_operand.vmem [shape: bf16[2,16,32], index: 3, kind: input, shape index: {}]   ;;  %s1570_s4 = inlined_call_operand.vmem [shape: f32[16,1], index: 4, kind: input, shape index: {}]   ;;  %s1571_s5 = inlined_call_operand.vmem [shape: f32[2,16,8], index: 5, kind: output, shape index: {}]  }
   0x1   :  { %s1453_s20 = smov 0  }
   0x2 LB: > { %s27_s21 = sadd.s32 1, %s1410_s19  ;;  %p1173_p0 = scmp.ge.s32.totalorder %s1414_s20, 1  ;;  %s1414_s20 = sphi %s1453_s20, %s15_s20   ;;  %s1410_s19 = sphi %s1451_s19, %s1573_s19   ;;  %s1406_s18 = sphi %s1449_s18, %s1572_s18  }
   0x3   : > { %p29_p1 = scmp.ge.s32.totalorder %s27_s21, 2  ;;  %p206_p2 = scmp.lt.s32.totalorder %s1414_s20, 3 }
   0x5   : > { %s1575_s21 = smov (%p29_p1, %s27_s21), 0  ;;  %p207_p3 = pnand %p1173_p0, %p206_p2 }
   0x6   : > { %p240_p4 = scmp.lt.s32.totalorder (!%p207_p3), %s1406_s18, 1  ;;  %v1382_v4 = vld [vmem:[%s1567_s1 + $0x10] sm:$0xff] (!%p207_p3)   ;;  %vm415_vm0 = vcmask (!%p207_p3), 31744   ;;  %v698_v5 = vld [vmem:[%s1568_s2 + $0x8] sm:$0xff] (!%p207_p3)  ;;  %v1416_v6 = vmov (!%p207_p3), 0   ;;  %v697_v7 = vld [vmem:[%s1568_s2] sm:$0xff] (!%p207_p3) }
   0x7   : > { %210 = sbr.rel (%p207_p3) target bundleno = 638 (0x27e), region = 40  ;;  %1259 = vmatprep.mubr.msk.bf16.mxu0 (!%p207_p3), %vm415_vm0, %v1382_v4  ;;  %1283 = vmatprep.mubr.msk.bf16.mxu1 (!%p207_p3), %vm415_vm0, %v1382_v4  ;;  %v699_v8 = vld [vmem:[%s1568_s2 + $0x10] sm:$0xff] (!%p207_p3)  ;;  %v1070_v9 = vld [vmem:[%s1570_s4 + $0x8] sm:$0xff] (!%p207_p3)  ;;  %v700_v10 = vld [vmem:[%s1568_s2 + $0x18] sm:$0xff] (!%p207_p3)  ;;  %vm422_vm1 = vcmask (!%p207_p3), 1041408   ;;  %v1417_v39 = vmov (!%p207_p3), 0.0  }
   0x8   : > { %v1069_v11 = vld [vmem:[%s1570_s4] sm:$0xff] (!%p207_p3)  ;;  %v1383_v17 = vld [vmem:[%s1567_s1 + $0x18] sm:$0xff] (!%p207_p3)   ;;  %v1385_v28 = vld [vmem:[%s1567_s1 + $0x8] sm:$0xff] (!%p207_p3)   ;;  %vm1418_vm2 = vmmov (!%p207_p3), 0   ;;  %vm975_vm3 = vcmask (!%p207_p3), 261120   ;;  %vm1083_vm4 = vcmask (!%p207_p3), 64512  }
   0x9   : > { %v1384_v20 = vld [vmem:[%s1567_s1] sm:$0xff] (!%p207_p3)   ;;  %v1387_v34 = vld [vmem:[%s1567_s1 + $0x28] sm:$0xff] (!%p207_p3)   ;;  %v1388_v35 = vld [vmem:[%s1567_s1 + $0x30] sm:$0xff] (!%p207_p3)  }
   0xa   : > { %v1386_v30 = vld [vmem:[%s1567_s1 + $0x20] sm:$0xff] (!%p207_p3)   ;;  %v1389_v38 = vld [vmem:[%s1567_s1 + $0x38] sm:$0xff] (!%p207_p3)  }
   0xe   : > { %s1577_s18 = smov (!%p240_p4, %s1406_s18), 1 }
   0xf   : > { %s1225_s22 = sshll.u32 %s1577_s18, 5  ;;  %s1226_s12 = sshll.u32 %s1577_s18, 4 }
  0x10   : > { %s247_s25 = scalar_lea.vmem %s1566_s0, %s1225_s22  ;;  %s255_s15 = scalar_lea.vmem %s1571_s5, %s1226_s12 }
  0x11   : > { %v1178_v0 = vld [vmem:[%s247_s25 + $0x8] sm:$0xff]  ;;  %v1179_v1 = vld [vmem:[%s247_s25 + $0x10] sm:$0xff]  ;;  %v257_v2 = vld [vmem:[%s247_s25] sm:$0xff] }
  0x12   : > { %293 = vxpose.xlu0.b32.start.end [1/1] (short) (narrow) %v1178_v0, 8  ;;  %328 = vxpose.xlu1.b32.start.end [1/1] (short) (narrow) %v1179_v1, 8  ;;  %v1180_v3 = vld [vmem:[%s247_s25 + $0x18] sm:$0xff] }
  0x16   : > { %258 = vxpose.xlu0.b32.start.end [1/1] (short) (narrow) %v257_v2, 8  ;;  %363 = vxpose.xlu1.b32.start.end [1/1] (short) (narrow) %v1180_v3, 8 }
  0x34   : > { %1381 = vset.pattern.permute.xlu1 %v1416_v6 }
  0x35   : > { %708 = vperm.xlu1 %1381, %v698_v5  }
  0x39   : > { %713 = vperm.xlu1 %1381, %v699_v8   ;;  %v1390_v8 = vld [vmem:[%s1569_s3] sm:$0xff]  }
  0x3d   : > { %718 = vperm.xlu1 %1381, %v700_v10  }
  0x3f   : > { %1380 = vset.pattern.permute.xlu0 %v1416_v6 }
  0x40   : > { %703 = vperm.xlu0 %1380, %v697_v7  }
  0x41   : > { %1073 = vperm.xlu1 %1381, %v1069_v11  }
  0x44   : > { %1078 = vperm.xlu0 %1380, %v1070_v9   ;;  %v1391_v9 = vld [vmem:[%s1569_s3 + $0x8] sm:$0xff]  }
  0x92   : > { %v309_v12 = vpop.trf.xlu0  ;;  %v344_v13 = vpop.trf.xlu1 }
  0x93   : > { %v325_v14 = vpack.c.bf16 %v309_v12, %v309_v12  ;;  %v360_v18 = vpack.c.bf16 %v344_v13, %v344_v13 }
  0x95   : > { %1345 = vmatprep.subr.msk.bf16.mxu0 %vm422_vm1, %v325_v14  ;;  %v424_v15 = vsel %vm422_vm1, %v325_v14, 0  ;;  %v734_v16 = vrot.slane %v325_v14, 2  ;;  %v842_v25 = vrot.slane %v360_v18, 2  ;;  %v565_v31 = vsel %vm422_vm1, %v360_v18, 0 }
  0x96   : > { %1258 = vmatpush3.bf16.msra.mxu0 %v424_v15  ;;  %v274_v19 = vpop.trf.xlu0  ;;  %v379_v27 = vpop.trf.xlu1 }
  0x97   : > { %v290_v21 = vpack.c.bf16 %v274_v19, %v274_v19  ;;  %1349 = vmatprep.subr.msk.bf16.mxu1 %vm422_vm1, %v734_v16  ;;  %v736_v22 = vsel %vm422_vm1, %v734_v16, 0  ;;  %v395_v29 = vpack.c.bf16 %v379_v27, %v379_v27  ;;  %v844_v32 = vsel %vm422_vm1, %v842_v25, 0 }
  0x98   : > { %1282 = vmatpush3.bf16.msra.mxu1 %v736_v22 }
  0x99   : > { %v788_v23 = vrot.slane %v290_v21, 2  ;;  %1260 = vmatmul.mubr.msk.bf16.vlgmr.msra.gmra.mrb[0].mxu0 %vm415_vm0, %v1383_v17  ;;  %1346 = vmatprep.subr.msk.bf16.mxu0 %vm422_vm1, %v290_v21  ;;  %v492_v24 = vsel %vm422_vm1, %v290_v21, 0  ;;  %v900_v33 = vrot.slane %v395_v29, 2  ;;  %v642_v36 = vsel %vm422_vm1, %v395_v29, 0 }
  0x9a   : > { %1264 = vmatpush3.bf16.msra.mxu0 %v492_v24  ;;  %1265 = vmatprep.mubr.msk.bf16.mxu0 %vm415_vm0, %v1384_v20 }
  0x9b   : > { %1284 = vmatmul.mubr.msk.bf16.vlgmr.msra.gmra.mrb[0].mxu1 %vm415_vm0, %v1383_v17  ;;  %1350 = vmatprep.subr.msk.bf16.mxu1 %vm422_vm1, %v788_v23  ;;  %v790_v26 = vsel %vm422_vm1, %v788_v23, 0  ;;  %v902_v37 = vsel %vm422_vm1, %v900_v33, 0 }
  0x9c   : > { %1288 = vmatpush3.bf16.msra.mxu1 %v790_v26  ;;  %1347 = vmatprep.subr.msk.bf16.mxu0 %vm422_vm1, %v360_v18 }
  0x9d   : > { %1289 = vmatprep.mubr.msk.bf16.mxu1 %vm415_vm0, %v1384_v20  ;;  %1351 = vmatprep.subr.msk.bf16.mxu1 %vm422_vm1, %v842_v25 }
  0xa5   : > { %1266 = vmatmul.mubr.msk.bf16.vlgmr.msra.gmra.mrb[0].mxu0 %vm415_vm0, %v1385_v28 }
  0xa6   : > { %1270 = vmatpush3.bf16.msra.mxu0 %v565_v31  ;;  %1271 = vmatprep.mubr.msk.bf16.mxu0 %vm415_vm0, %v1386_v30 }
  0xa7   : > { %1290 = vmatmul.mubr.msk.bf16.vlgmr.msra.gmra.mrb[0].mxu1 %vm415_vm0, %v1385_v28  ;;  %1348 = vmatprep.subr.msk.bf16.mxu0 %vm422_vm1, %v395_v29 }
  0xa8   : > { %1294 = vmatpush3.bf16.msra.mxu1 %v844_v32  ;;  %1295 = vmatprep.mubr.msk.bf16.mxu1 %vm415_vm0, %v1386_v30 }
  0xa9   : > { %1352 = vmatprep.subr.msk.bf16.mxu1 %vm422_vm1, %v900_v33 }
  0xb1   : > { %1272 = vmatmul.mubr.msk.bf16.vlgmr.msra.gmra.mrb[0].mxu0 %vm415_vm0, %v1387_v34 }
  0xb2   : > { %1276 = vmatpush3.bf16.msra.mxu0 %v642_v36  ;;  %1277 = vmatprep.mubr.msk.bf16.mxu0 %vm415_vm0, %v1388_v35 }
  0xb3   : > { %1296 = vmatmul.mubr.msk.bf16.vlgmr.msra.gmra.mrb[0].mxu1 %vm415_vm0, %v1387_v34  ;;  %1305 = vmatprep.subr.bf16.mxu0 %v1417_v39 }
  0xb4   : > { %1300 = vmatpush3.bf16.msra.mxu1 %v902_v37  ;;  %1301 = vmatprep.mubr.msk.bf16.mxu1 %vm415_vm0, %v1388_v35  ;;  %v709_v40 = vpop.permute.xlu1 %708 }
  0xb5   : > { %1313 = vmatprep.subr.bf16.mxu1 %v1417_v39 }
  0xb8   : > { %v714_v41 = vpop.permute.xlu1 %713 }
  0xbc   : > { %v719_v44 = vpop.permute.xlu1 %718 }
  0xbd   : > { %1278 = vmatmul.mubr.msk.bf16.vlgmr.msra.gmra.mrb[0].mxu0 %vm415_vm0, %v1389_v38 }
  0xbe   : > { %1309 = vmatprep.mubr.msk.bf16.mxu0 %vm1418_vm2, %v1417_v39 }
  0xbf   : > { %1302 = vmatmul.mubr.msk.bf16.vlgmr.msra.gmra.mrb[0].mxu1 %vm415_vm0, %v1389_v38  ;;  %v704_v42 = vpop.permute.xlu0 %703 }
  0xc0   : > { %1317 = vmatprep.mubr.msk.bf16.mxu1 %vm1418_vm2, %v1417_v39  ;;  %v1074_v17 = vpop.permute.xlu1 %1073 }
  0xc3   : > { %v1079_v22 = vpop.permute.xlu0 %1078 }
 0x190   : > { %v1279_v43 = vpop.f32.mrb[0].mxu0 }
 0x191   : > { %v723_v45 = vadd.f32 %v1279_v43, %v714_v41  ;;  %v678_v46 = vpop.f32.mrb[1].mxu0 }
 0x192   : > { %v721_v47 = vadd.f32 %v704_v42, %v678_v46  ;;  %v1280_v48 = vpop.f32.mrb[2].mxu0  ;;  %v1303_v49 = vpop.f32.mrb[0].mxu1 }
 0x193   : > { %v724_v50 = vadd.f32 %v1280_v48, %v719_v44  ;;  %v959_v51 = vadd.f32 %v1303_v49, %v714_v41  ;;  %v681_v52 = vpop.f32.mrb[3].mxu0  ;;  %v938_v53 = vpop.f32.mrb[1].mxu1  ;;  %v727_v57 = vmax.f32 %v723_v45, 0.0 }
 0x194   : > { %v722_v54 = vadd.f32 %v709_v40, %v681_v52  ;;  %v957_v55 = vadd.f32 %v938_v53, %v704_v42  ;;  %v1304_v56 = vpop.f32.mrb[2].mxu1  ;;  %v725_v61 = vmax.f32 %v721_v47, 0.0 }
 0x195   : > { %v728_v58 = vmax.f32 %v724_v50, 0.0  ;;  %v960_v59 = vadd.f32 %v1304_v56, %v719_v44  ;;  %v941_v60 = vpop.f32.mrb[3].mxu1  ;;  %v963_v1 = vmax.f32 %v959_v51, 0.0 }
 0x196   : > { %v726_v62 = vmax.f32 %v722_v54, 0.0  ;;  %v958_v63 = vadd.f32 %v941_v60, %v709_v40  ;;  %v961_v4 = vmax.f32 %v957_v55, 0.0 }
 0x197   : > { %v732_v0 = vpack.c.bf16 %v728_v58, %v727_v57  ;;  %v964_v2 = vmax.f32 %v960_v59, 0.0 }
 0x198   : > { %v731_v3 = vpack.c.bf16 %v726_v62, %v725_v61  ;;  %v962_v5 = vmax.f32 %v958_v63, 0.0 }
 0x199   : > { %v969_v6 = vpack.c.bf16 %v964_v2, %v963_v1 }
 0x19a   : > { %v968_v7 = vpack.c.bf16 %v962_v5, %v961_v4  ;;  %1314 = vmatpush3.bf16.msra.mxu1 %v731_v3 }
 0x19b   : > { %1315 = vmatprep.subr.bf16.mxu1 %v1417_v39 }
 0x19c   : > { %1306 = vmatpush3.bf16.msra.mxu0 %v968_v7 }
 0x19d   : > { %1307 = vmatprep.subr.bf16.mxu0 %v1417_v39 }
 0x19e   : > { %1316 = vmatpush3.bf16.msra.mxu1 %v732_v0 }
 0x1a0   : > { %1308 = vmatpush3.bf16.msra.mxu0 %v969_v6 }
 0x1a1   : > { %1318 = vmatmul.mubr.msk.bf16.vlgmr.msra.gmra.mrb[4].mxu1 %vm975_vm3, %v1390_v8 }
 0x1a3   : > { %1310 = vmatmul.mubr.msk.bf16.vlgmr.msra.gmra.mrb[4].mxu0 %vm975_vm3, %v1391_v9 }
 0x274   : > { %v1062_v10 = vpop.f32.mrb[4].mxu1 }
 0x275   : > { %v1319_v11 = vpop.f32.mrb[5].mxu1 }
 0x276   : > { %v1013_v12 = vpop.f32.mrb[4].mxu0  ;;  %v1065_v13 = vpop.f32.mrb[6].mxu1 }
 0x277   : > { %v1063_v14 = vadd.f32 %v1062_v10, %v1013_v12  ;;  %v1311_v15 = vpop.f32.mrb[5].mxu0  ;;  %v1320_v16 = vpop.f32.mrb[7].mxu1 }
 0x278   : > { %v1016_v18 = vpop.f32.mrb[6].mxu0 }
 0x279   : > { %v1081_v19 = vadd.f32 %v1074_v17, %v1063_v14  ;;  %v1066_v20 = vadd.f32 %v1065_v13, %v1016_v18  ;;  %v1312_v21 = vpop.f32.mrb[7].mxu0 }
 0x27b   : > { %1084 = vst.msk [vmem:[%s255_s15] sm:$0xff] %vm1083_vm4, %v1081_v19  ;;  %v1082_v23 = vadd.f32 %v1079_v22, %v1066_v20 }
 0x27d   : > { %1085 = vst.msk [vmem:[%s255_s15 + $0x8] sm:$0xff] %vm1083_vm4, %v1082_v23 }
 0x27e PF: > { %s15_s20 = sadd.s32 1, %s1414_s20   ;;  %s1572_s18 = smov %s1410_s19 }
 0x27f   : > { %p12_p5 = scmp.ge.s32.totalorder %s15_s20, 4   ;;  %s1573_s19 = smov %s1575_s21 }
 0x281   :  { %14 = sbr.rel (!%p12_p5) target bundleno = 2 (0x2), region = 77 }

</bundles_post_ra>
